<compile_context>
chip_gen: v6e
topology: v6e:2x2x1
jax: 0.10.0
libtpu: 0.0.40
codegen_flags: <defaults>
</compile_context>

<pallas_src>
import functools

import jax
import jax.numpy as jnp
import numpy as np
from jax.experimental import pallas as pl
from jax.experimental.pallas import tpu as pltpu

LANE = 128  # lane-dense padding target for every GEMM output dim


def _round_up(x, m):
    return ((x + m - 1) // m) * m


# ---------------------------------------------------------------------------
# single fused kernel: conv GEMM -> ReLU -> GAP -> fc heads -> meta MLP
# ---------------------------------------------------------------------------
def _stacked_forward_kernel(p_ref, wc_ref, wfc_ref, bfc_ref, mask_ref,
                            w1_ref, b1_ref, w2_ref, b2_ref,
                            slab_ref, meta_ref, *, hw, inv_hw):
    """Grid = (batch_tiles,), fully parallel (no cross-step state).

    p_ref    : (TB, HW, KP)  bf16  im2col patches (K = 9*Cin zero-padded to KP)
    wc_ref   : (KP, CP)      bf16  all stems' 3x3 filters, Cout padded to 128
    wfc_ref  : (CP, NPAD)    bf16  block-diagonal fc heads
    w1/w2    : meta MLP weights, 128-lane padded
    slab_ref : (TB, 1, NPAD) f32   [base0 logits | base1 logits | image feats | 0]
    meta_ref : (TB, 1, OP)   f32   meta-learner logits
    """
    tb = p_ref.shape[0]
    kp = p_ref.shape[2]
    cp = wc_ref.shape[1]

    # (1) stacked-K conv GEMM: one MXU dot, internal accumulation over all 9 taps.
    p = p_ref[...].reshape(tb * hw, kp)                              # bf16
    act = jnp.dot(p, wc_ref[...], preferred_element_type=jnp.float32)
    act = jnp.maximum(act, 0.0)                                      # ReLU epilogue

    # global average pool per image (sublane reduction -> XLU slot, MXU idle anyway)
    feats = jnp.sum(act.reshape(tb, hw, cp), axis=1) * inv_hw        # (TB, CP) f32

    # (2) all fc heads in one GEMM; ReLU only on image-extractor columns (mask==1),
    #     base-learner logits stay raw.
    fb = feats.astype(jnp.bfloat16)
    slab = jnp.dot(fb, wfc_ref[...], preferred_element_type=jnp.float32) + bfc_ref[...]
    slab = jnp.where(mask_ref[...] > 0.0, jnp.maximum(slab, 0.0), slab)
    slab_ref[...] = slab[:, None, :]

    # (3)+(4) meta MLP consumes the slab directly; hidden layer never leaves VMEM.
    h = jnp.dot(slab.astype(jnp.bfloat16), w1_ref[...],
                preferred_element_type=jnp.float32) + b1_ref[...]
    h = jnp.maximum(h, 0.0)
    meta = jnp.dot(h.astype(jnp.bfloat16), w2_ref[...],
                   preferred_element_type=jnp.float32) + b2_ref[...]
    meta_ref[...] = meta[:, None, :]


def _pick_tile_b(batch, hw):
    """>=2 grid steps when B>=2 (v7x 2-TC split); cap rows/step for vreg/VMEM sanity."""
    tb = 1 if batch < 16 else 8
    tb = max(1, min(tb, max(1, 2048 // hw)))
    return tb


def stacked_forward_pallas(packed, patches, *, tile_b):
    B, hw, kp = patches.shape
    cp = packed["conv_w"].shape[1]
    npad = packed["fc_w"].shape[1]
    hp = packed["meta_w1"].shape[1]
    op = packed["meta_w2"].shape[1]

    bpad = _round_up(B, tile_b)
    if bpad != B:
        patches = jnp.pad(patches, ((0, bpad - B), (0, 0), (0, 0)))

    kern = functools.partial(_stacked_forward_kernel, hw=hw, inv_hw=1.0 / float(hw))

    slab, meta = pl.pallas_call(
        kern,
        out_shape=(jax.ShapeDtypeStruct((bpad, 1, npad), jnp.float32),
                   jax.ShapeDtypeStruct((bpad, 1, op), jnp.float32)),
        grid=(bpad // tile_b,),
        in_specs=[
            pl.BlockSpec((tile_b, hw, kp), lambda m: (m, 0, 0)),   # patches
            pl.BlockSpec((kp, cp), lambda m: (0, 0)),              # conv weights
            pl.BlockSpec((cp, npad), lambda m: (0, 0)),            # fc heads
            pl.BlockSpec((1, npad), lambda m: (0, 0)),             # fc bias
            pl.BlockSpec((1, npad), lambda m: (0, 0)),             # relu mask
            pl.BlockSpec((npad, hp), lambda m: (0, 0)),            # meta w1
            pl.BlockSpec((1, hp), lambda m: (0, 0)),               # meta b1
            pl.BlockSpec((hp, op), lambda m: (0, 0)),              # meta w2
            pl.BlockSpec((1, op), lambda m: (0, 0)),               # meta b2
        ],
        out_specs=(pl.BlockSpec((tile_b, 1, npad), lambda m: (m, 0, 0)),
                   pl.BlockSpec((tile_b, 1, op), lambda m: (m, 0, 0))),
        compiler_params=pltpu.CompilerParams(dimension_semantics=("parallel",)),
    )(patches, packed["conv_w"], packed["fc_w"], packed["fc_b"], packed["relu_mask"],
      packed["meta_w1"], packed["meta_b1"], packed["meta_w2"], packed["meta_b2"])

    return slab.reshape(bpad, npad)[:B], meta.reshape(bpad, op)[:B]


# ---------------------------------------------------------------------------
# fused wrapper preamble: NCHW -> padded 3x3 im2col patches, bf16, lane-packed K
# ---------------------------------------------------------------------------
def _im2col_patches(x_nchw, *, kp):
    """(B,C,H,W) -> (B, H*W, KP) bf16; column order (dh, dw, ci) matches the packed
    conv weights. Absorbs the NCHW->NHWC transpose, zero-pad and bf16 cast."""
    B, C, H, W = x_nchw.shape
    xp = jnp.pad(x_nchw.astype(jnp.float32), ((0, 0), (0, 0), (1, 1), (1, 1)))
    cols = [xp[:, ci, dh:dh + H, dw:dw + W]
            for dh in range(3) for dw in range(3) for ci in range(C)]
    patches = jnp.stack(cols, axis=-1).reshape(B, H * W, 9 * C)
    patches = jnp.pad(patches, ((0, 0), (0, 0), (0, kp - 9 * C)))
    return patches.astype(jnp.bfloat16)


# ---------------------------------------------------------------------------
# parameter init (host side) + packing into lane-dense block matrices
# ---------------------------------------------------------------------------
def init_params(key, *, num_base=2, num_classes=10, in_ch=3, stem_ch=8,
                image_features_dim=32, meta_hidden=64):
    keys = iter(jax.random.split(key, 32))
    scale = 0.05

    def rnd(shape):
        return scale * jax.random.normal(next(keys), shape, dtype=jnp.float32)

    base_learners, prev_fc_flat = [], []
    for i in range(num_base):
        conv_w = rnd((3, 3, in_ch, stem_ch))
        fc_w = rnd((stem_ch, num_classes))
        fc_b = rnd((num_classes,))
        if i > 0:
            # mirrors BaseLearner._initialize_orthogonal_weights for the fc head:
            # project out previous fc weights, then L2-normalize.
            w_flat = fc_w.reshape(-1)
            for p in prev_fc_flat:
                w_flat = w_flat - (jnp.dot(w_flat, p) / (jnp.dot(p, p) + 1e-12)) * p
            w_flat = w_flat / (jnp.linalg.norm(w_flat) + 1e-12)
            fc_w = w_flat.reshape(fc_w.shape)
        prev_fc_flat.append(fc_w.reshape(-1))
        base_learners.append({"conv_w": conv_w, "fc_w": fc_w, "fc_b": fc_b})

    image_extractor = {
        "conv_w": rnd((3, 3, in_ch, stem_ch)),
        "fc_w": rnd((stem_ch, image_features_dim)),
        "fc_b": rnd((image_features_dim,)),
    }

    meta_in_dim = num_classes * num_base + image_features_dim
    meta_learner = {
        "w1": rnd((meta_in_dim, meta_hidden)),
        "b1": rnd((meta_hidden,)),
        "w2": rnd((meta_hidden, num_classes)),
        "b2": rnd((num_classes,)),
    }
    return {"base_learners": base_learners,
            "image_extractor": image_extractor,
            "meta_learner": meta_learner}


def pack_params(params, *, cp=LANE, npad=LANE, hp=LANE, op=LANE):
    """Stack all stems into one conv GEMM and all heads into one block-diag fc GEMM."""
    stems = list(params["base_learners"]) + [params["image_extractor"]]
    stem_ch = stems[0]["conv_w"].shape[-1]
    cin = stems[0]["conv_w"].shape[2]
    c_total = stem_ch * len(stems)
    out_dims = [s["fc_w"].shape[1] for s in stems]
    n_total = int(sum(out_dims))
    kp = _round_up(9 * cin, 8)                       # stacked-K, sublane-aligned
    assert c_total <= cp and n_total <= npad

    conv = jnp.concatenate([s["conv_w"] for s in stems], axis=-1)      # (3,3,Cin,Ct)
    conv = jnp.pad(conv, ((0, 0), (0, 0), (0, 0), (0, cp - c_total)))
    conv = conv.reshape(9 * cin, cp)                                   # rows = (dh,dw,ci)
    conv = jnp.pad(conv, ((0, kp - 9 * cin), (0, 0))).astype(jnp.bfloat16)

    wfc = jnp.zeros((cp, npad), jnp.float32)
    bfc = jnp.zeros((1, npad), jnp.float32)
    mask = jnp.zeros((1, npad), jnp.float32)
    col = 0
    for i, s in enumerate(stems):
        od = out_dims[i]
        r0 = i * stem_ch
        wfc = wfc.at[r0:r0 + stem_ch, col:col + od].set(s["fc_w"])
        bfc = bfc.at[0, col:col + od].set(s["fc_b"])
        if i == len(stems) - 1:            # image extractor head uses ReLU
            mask = mask.at[0, col:col + od].set(1.0)
        col += od

    m = params["meta_learner"]
    meta_in_dim, meta_hidden = m["w1"].shape
    nclasses = m["w2"].shape[1]
    assert meta_in_dim == n_total and meta_hidden <= hp and nclasses <= op
    w1 = jnp.zeros((npad, hp), jnp.float32).at[:meta_in_dim, :meta_hidden].set(m["w1"])
    b1 = jnp.zeros((1, hp), jnp.float32).at[0, :meta_hidden].set(m["b1"])
    w2 = jnp.zeros((hp, op), jnp.float32).at[:meta_hidden, :nclasses].set(m["w2"])
    b2 = jnp.zeros((1, op), jnp.float32).at[0, :nclasses].set(m["b2"])

    return {"conv_w": conv,
            "fc_w": wfc.astype(jnp.bfloat16), "fc_b": bfc, "relu_mask": mask,
            "meta_w1": w1.astype(jnp.bfloat16), "meta_b1": b1,
            "meta_w2": w2.astype(jnp.bfloat16), "meta_b2": b2}


# ---------------------------------------------------------------------------
# forward
# ---------------------------------------------------------------------------
@functools.partial(jax.jit, static_argnames=("num_base", "num_classes"))
def stacked_model_forward(packed, x_nchw, *, num_base, num_classes):
    kp = packed["conv_w"].shape[0]
    patches = _im2col_patches(x_nchw, kp=kp)                  # (B, HW, KP) bf16
    B, hw, _ = patches.shape
    tile_b = _pick_tile_b(B, hw)
    slab, meta = stacked_forward_pallas(packed, patches, tile_b=tile_b)
    base_outputs = [slab[:, i * num_classes:(i + 1) * num_classes]
                    for i in range(num_base)]
    return {"base_outputs": base_outputs, "meta_output": meta[:, :num_classes]}


def reference_forward(packed, x_nchw, *, num_base, num_classes):
    """Pure-JAX reference on the same bf16-rounded operands (sanity check)."""
    hi = jax.lax.Precision.HIGHEST
    kp = packed["conv_w"].shape[0]
    patches = _im2col_patches(x_nchw, kp=kp).astype(jnp.float32)
    B, hw, _ = patches.shape
    wc = packed["conv_w"].astype(jnp.float32)
    act = jnp.maximum(jnp.dot(patches.reshape(B * hw, kp), wc, precision=hi), 0.0)
    feats = jnp.mean(act.reshape(B, hw, -1), axis=1)
    slab = jnp.dot(feats.astype(jnp.bfloat16).astype(jnp.float32),
                   packed["fc_w"].astype(jnp.float32), precision=hi) + packed["fc_b"]
    slab = jnp.where(packed["relu_mask"] > 0.0, jnp.maximum(slab, 0.0), slab)
    h = jnp.maximum(jnp.dot(slab.astype(jnp.bfloat16).astype(jnp.float32),
                            packed["meta_w1"].astype(jnp.float32), precision=hi)
                    + packed["meta_b1"], 0.0)
    meta = jnp.dot(h.astype(jnp.bfloat16).astype(jnp.float32),
                   packed["meta_w2"].astype(jnp.float32), precision=hi) + packed["meta_b2"]
    base_outputs = [slab[:, i * num_classes:(i + 1) * num_classes]
                    for i in range(num_base)]
    return {"base_outputs": base_outputs, "meta_output": meta[:, :num_classes]}


# ---------------------------------------------------------------------------
# driver
# ---------------------------------------------------------------------------
if __name__ == "__main__":
    key = jax.random.PRNGKey(0)
    pkey, xkey = jax.random.split(key)

    num_base = 2
    num_classes = 10
    B, C, H, W = 2, 3, 16, 16

    params = init_params(pkey, num_base=num_base, num_classes=num_classes, in_ch=C,
                         stem_ch=8, image_features_dim=32, meta_hidden=64)
    packed = pack_params(params)
    x = jax.random.normal(xkey, (B, C, H, W), dtype=jnp.float32)       # NCHW like PyTorch

    out = stacked_model_forward(packed, x, num_base=num_base, num_classes=num_classes)
    out = jax.block_until_ready(out)

    # numerical sanity check vs. pure-JAX reference on identically bf16-rounded operands
    ref = reference_forward(packed, x, num_base=num_base, num_classes=num_classes)
    for o, r in zip(out["base_outputs"], ref["base_outputs"]):
        np.testing.assert_allclose(np.asarray(o), np.asarray(r), atol=5e-3, rtol=5e-2)
    np.testing.assert_allclose(np.asarray(out["meta_output"]),
                               np.asarray(ref["meta_output"]), atol=5e-3, rtol=5e-2)

    assert len(out["base_outputs"]) == num_base
    assert out["base_outputs"][0].shape == (B, num_classes)
    assert out["meta_output"].shape == (B, num_classes)
    print("KERNEL_OK")
</pallas_src>

<mosaic_0001>
module attributes {stable_mosaic.version = 11 : i64} {
  func.func @_stacked_forward_kernel(%arg0: i32, %arg1: memref<1x256x32xbf16, #tpu.memory_space<vmem>>, %arg2: memref<32x128xbf16, #tpu.memory_space<vmem>>, %arg3: memref<128x128xbf16, #tpu.memory_space<vmem>>, %arg4: memref<1x128xf32, #tpu.memory_space<vmem>>, %arg5: memref<1x128xf32, #tpu.memory_space<vmem>>, %arg6: memref<128x128xbf16, #tpu.memory_space<vmem>>, %arg7: memref<1x128xf32, #tpu.memory_space<vmem>>, %arg8: memref<128x128xbf16, #tpu.memory_space<vmem>>, %arg9: memref<1x128xf32, #tpu.memory_space<vmem>>, %arg10: memref<1x1x128xf32, #tpu.memory_space<vmem>>, %arg11: memref<1x1x128xf32, #tpu.memory_space<vmem>>) attributes {dimension_semantics = [#tpu.dimension_semantics<parallel>], iteration_bounds = array<i64: 2>, scalar_prefetch = 0 : i64, scratch_operands = 0 : i64, tpu.core_type = #tpu.core_type<tc>, window_params = [{transform_indices = @transform_0, window_bounds = array<i64: 1, 256, 32>}, {pipeline_mode = #tpu.pipeline_mode<synchronous>, transform_indices = @transform_1, window_bounds = array<i64: 32, 128>}, {pipeline_mode = #tpu.pipeline_mode<synchronous>, transform_indices = @transform_2, window_bounds = array<i64: 128, 128>}, {pipeline_mode = #tpu.pipeline_mode<synchronous>, transform_indices = @transform_3, window_bounds = array<i64: 1, 128>}, {pipeline_mode = #tpu.pipeline_mode<synchronous>, transform_indices = @transform_4, window_bounds = array<i64: 1, 128>}, {pipeline_mode = #tpu.pipeline_mode<synchronous>, transform_indices = @transform_5, window_bounds = array<i64: 128, 128>}, {pipeline_mode = #tpu.pipeline_mode<synchronous>, transform_indices = @transform_6, window_bounds = array<i64: 1, 128>}, {pipeline_mode = #tpu.pipeline_mode<synchronous>, transform_indices = @transform_7, window_bounds = array<i64: 128, 128>}, {pipeline_mode = #tpu.pipeline_mode<synchronous>, transform_indices = @transform_8, window_bounds = array<i64: 1, 128>}, {transform_indices = @transform_9, window_bounds = array<i64: 1, 1, 128>}, {transform_indices = @transform_10, window_bounds = array<i64: 1, 1, 128>}]} {
    %c0 = arith.constant 0 : index
    %c0_0 = arith.constant 0 : index
    %c0_1 = arith.constant 0 : index
    %0 = vector.load %arg1[%c0, %c0_0, %c0_1] : memref<1x256x32xbf16, #tpu.memory_space<vmem>>, vector<1x256x32xbf16>
    %1 = vector.shape_cast %0 : vector<1x256x32xbf16> to vector<256x32xbf16>
    %c0_2 = arith.constant 0 : index
    %c0_3 = arith.constant 0 : index
    %2 = vector.load %arg2[%c0_2, %c0_3] : memref<32x128xbf16, #tpu.memory_space<vmem>>, vector<32x128xbf16>
    %cst = arith.constant dense<0.000000e+00> : vector<256x128xf32>
    %3 = tpu.matmul %1, %2, %cst {dimension_numbers = #tpu.dot_dimension_numbers<[1], [0], [0], [1], [0, 0, 1, 1], [], []>} : vector<256x32xbf16>, vector<32x128xbf16>, vector<256x128xf32> -> vector<256x128xf32>
    %cst_4 = arith.constant 0.000000e+00 : f32
    %4 = vector.broadcast %cst_4 : f32 to vector<256x128xf32>
    %5 = arith.maximumf %3, %4 : vector<256x128xf32>
    %6 = vector.shape_cast %5 : vector<256x128xf32> to vector<1x256x128xf32>
    %cst_5 = arith.constant dense<0.000000e+00> : vector<1x128xf32>
    %7 = vector.multi_reduction <add>, %6, %cst_5 [1] : vector<1x256x128xf32> to vector<1x128xf32>
    %cst_6 = arith.constant 3.906250e-03 : f32
    %8 = vector.broadcast %cst_6 : f32 to vector<1x128xf32>
    %9 = arith.mulf %7, %8 : vector<1x128xf32>
    %10 = arith.truncf %9 : vector<1x128xf32> to vector<1x128xbf16>
    %c0_7 = arith.constant 0 : index
    %c0_8 = arith.constant 0 : index
    %11 = vector.load %arg3[%c0_7, %c0_8] : memref<128x128xbf16, #tpu.memory_space<vmem>>, vector<128x128xbf16>
    %cst_9 = arith.constant dense<0.000000e+00> : vector<1x128xf32>
    %12 = tpu.matmul %10, %11, %cst_9 {dimension_numbers = #tpu.dot_dimension_numbers<[1], [0], [0], [1], [0, 0, 1, 1], [], []>} : vector<1x128xbf16>, vector<128x128xbf16>, vector<1x128xf32> -> vector<1x128xf32>
    %c0_10 = arith.constant 0 : index
    %c0_11 = arith.constant 0 : index
    %13 = vector.load %arg4[%c0_10, %c0_11] : memref<1x128xf32, #tpu.memory_space<vmem>>, vector<1x128xf32>
    %14 = arith.addf %12, %13 : vector<1x128xf32>
    %c0_12 = arith.constant 0 : index
    %c0_13 = arith.constant 0 : index
    %15 = vector.load %arg5[%c0_12, %c0_13] : memref<1x128xf32, #tpu.memory_space<vmem>>, vector<1x128xf32>
    %cst_14 = arith.constant 0.000000e+00 : f32
    %16 = vector.broadcast %cst_14 : f32 to vector<1x128xf32>
    %17 = arith.cmpf ogt, %15, %16 : vector<1x128xf32>
    %cst_15 = arith.constant 0.000000e+00 : f32
    %18 = vector.broadcast %cst_15 : f32 to vector<1x128xf32>
    %19 = arith.maximumf %14, %18 : vector<1x128xf32>
    %20 = arith.select %17, %19, %14 : vector<1x128xi1>, vector<1x128xf32>
    %21 = vector.shape_cast %20 : vector<1x128xf32> to vector<1x1x128xf32>
    %c0_16 = arith.constant 0 : index
    %c0_17 = arith.constant 0 : index
    %c0_18 = arith.constant 0 : index
    %22 = vector.load %arg10[%c0_16, %c0_17, %c0_18] : memref<1x1x128xf32, #tpu.memory_space<vmem>>, vector<1x1x128xf32>
    tpu.vector_store %arg10[%c0_16, %c0_17, %c0_18], %21 {strides = array<i32>} : memref<1x1x128xf32, #tpu.memory_space<vmem>>, vector<1x1x128xf32>,
    %23 = arith.truncf %20 : vector<1x128xf32> to vector<1x128xbf16>
    %c0_19 = arith.constant 0 : index
    %c0_20 = arith.constant 0 : index
    %24 = vector.load %arg6[%c0_19, %c0_20] : memref<128x128xbf16, #tpu.memory_space<vmem>>, vector<128x128xbf16>
    %cst_21 = arith.constant dense<0.000000e+00> : vector<1x128xf32>
    %25 = tpu.matmul %23, %24, %cst_21 {dimension_numbers = #tpu.dot_dimension_numbers<[1], [0], [0], [1], [0, 0, 1, 1], [], []>} : vector<1x128xbf16>, vector<128x128xbf16>, vector<1x128xf32> -> vector<1x128xf32>
    %c0_22 = arith.constant 0 : index
    %c0_23 = arith.constant 0 : index
    %26 = vector.load %arg7[%c0_22, %c0_23] : memref<1x128xf32, #tpu.memory_space<vmem>>, vector<1x128xf32>
    %27 = arith.addf %25, %26 : vector<1x128xf32>
    %cst_24 = arith.constant 0.000000e+00 : f32
    %28 = vector.broadcast %cst_24 : f32 to vector<1x128xf32>
    %29 = arith.maximumf %27, %28 : vector<1x128xf32>
    %30 = arith.truncf %29 : vector<1x128xf32> to vector<1x128xbf16>
    %c0_25 = arith.constant 0 : index
    %c0_26 = arith.constant 0 : index
    %31 = vector.load %arg8[%c0_25, %c0_26] : memref<128x128xbf16, #tpu.memory_space<vmem>>, vector<128x128xbf16>
    %cst_27 = arith.constant dense<0.000000e+00> : vector<1x128xf32>
    %32 = tpu.matmul %30, %31, %cst_27 {dimension_numbers = #tpu.dot_dimension_numbers<[1], [0], [0], [1], [0, 0, 1, 1], [], []>} : vector<1x128xbf16>, vector<128x128xbf16>, vector<1x128xf32> -> vector<1x128xf32>
    %c0_28 = arith.constant 0 : index
    %c0_29 = arith.constant 0 : index
    %33 = vector.load %arg9[%c0_28, %c0_29] : memref<1x128xf32, #tpu.memory_space<vmem>>, vector<1x128xf32>
    %34 = arith.addf %32, %33 : vector<1x128xf32>
    %35 = vector.shape_cast %34 : vector<1x128xf32> to vector<1x1x128xf32>
    %c0_30 = arith.constant 0 : index
    %c0_31 = arith.constant 0 : index
    %c0_32 = arith.constant 0 : index
    %36 = vector.load %arg11[%c0_30, %c0_31, %c0_32] : memref<1x1x128xf32, #tpu.memory_space<vmem>>, vector<1x1x128xf32>
    tpu.vector_store %arg11[%c0_30, %c0_31, %c0_32], %35 {strides = array<i32>} : memref<1x1x128xf32, #tpu.memory_space<vmem>>, vector<1x1x128xf32>,
    return
  }
  func.func @transform_0(%arg0: i32) -> (i32, i32, i32) {
    %c0_i32 = arith.constant 0 : i32
    %c0_i32_0 = arith.constant 0 : i32
    %c0_i32_1 = arith.constant 0 : i32
    return %arg0, %c0_i32, %c0_i32_0 : i32, i32, i32
  }
  func.func @transform_1(%arg0: i32) -> (i32, i32) {
    %c0_i32 = arith.constant 0 : i32
    %c0_i32_0 = arith.constant 0 : i32
    %c0_i32_1 = arith.constant 0 : i32
    return %c0_i32, %c0_i32_0 : i32, i32
  }
  func.func @transform_2(%arg0: i32) -> (i32, i32) {
    %c0_i32 = arith.constant 0 : i32
    %c0_i32_0 = arith.constant 0 : i32
    %c0_i32_1 = arith.constant 0 : i32
    return %c0_i32, %c0_i32_0 : i32, i32
  }
  func.func @transform_3(%arg0: i32) -> (i32, i32) {
    %c0_i32 = arith.constant 0 : i32
    %c0_i32_0 = arith.constant 0 : i32
    %c0_i32_1 = arith.constant 0 : i32
    return %c0_i32, %c0_i32_0 : i32, i32
  }
  func.func @transform_4(%arg0: i32) -> (i32, i32) {
    %c0_i32 = arith.constant 0 : i32
    %c0_i32_0 = arith.constant 0 : i32
    %c0_i32_1 = arith.constant 0 : i32
    return %c0_i32, %c0_i32_0 : i32, i32
  }
  func.func @transform_5(%arg0: i32) -> (i32, i32) {
    %c0_i32 = arith.constant 0 : i32
    %c0_i32_0 = arith.constant 0 : i32
    %c0_i32_1 = arith.constant 0 : i32
    return %c0_i32, %c0_i32_0 : i32, i32
  }
  func.func @transform_6(%arg0: i32) -> (i32, i32) {
    %c0_i32 = arith.constant 0 : i32
    %c0_i32_0 = arith.constant 0 : i32
    %c0_i32_1 = arith.constant 0 : i32
    return %c0_i32, %c0_i32_0 : i32, i32
  }
  func.func @transform_7(%arg0: i32) -> (i32, i32) {
    %c0_i32 = arith.constant 0 : i32
    %c0_i32_0 = arith.constant 0 : i32
    %c0_i32_1 = arith.constant 0 : i32
    return %c0_i32, %c0_i32_0 : i32, i32
  }
  func.func @transform_8(%arg0: i32) -> (i32, i32) {
    %c0_i32 = arith.constant 0 : i32
    %c0_i32_0 = arith.constant 0 : i32
    %c0_i32_1 = arith.constant 0 : i32
    return %c0_i32, %c0_i32_0 : i32, i32
  }
  func.func @transform_9(%arg0: i32) -> (i32, i32, i32) {
    %c0_i32 = arith.constant 0 : i32
    %c0_i32_0 = arith.constant 0 : i32
    %c0_i32_1 = arith.constant 0 : i32
    return %arg0, %c0_i32, %c0_i32_0 : i32, i32, i32
  }
  func.func @transform_10(%arg0: i32) -> (i32, i32, i32) {
    %c0_i32 = arith.constant 0 : i32
    %c0_i32_0 = arith.constant 0 : i32
    %c0_i32_1 = arith.constant 0 : i32
    return %arg0, %c0_i32, %c0_i32_0 : i32, i32, i32
  }
}

</mosaic_0001>

<bundles_post_ra>
// kernel: stacked_model_forward.1
= control target key start
LH: loop header
LB: loop body
LE: loop exit
PB: predicated region body
PF: predicated region fallthrough
CT: control target
= control target key end

     0   :  { %16 = vsyncpa [#allocation3], 0  ;;  %s1865_s0 = inlined_call_operand.vmem [shape: bf16[2,256,32], index: 0, kind: input, shape index: {}]   ;;  %s1866_s1 = inlined_call_operand.vmem [shape: bf16[32,128], index: 1, kind: input, shape index: {}]   ;;  %s1867_s2 = inlined_call_operand.vmem [shape: bf16[128,128], index: 2, kind: input, shape index: {}]   ;;  %s1868_s3 = inlined_call_operand.vmem [shape: f32[1,128], index: 3, kind: input, shape index: {}]   ;;  %s1869_s4 = inlined_call_operand.vmem [shape: f32[1,128], index: 4, kind: input, shape index: {}]   ;;  %s1870_s5 = inlined_call_operand.vmem [shape: bf16[128,128], index: 5, kind: input, shape index: {}]   ;;  %s1871_s6 = inlined_call_operand.vmem [shape: f32[1,128], index: 6, kind: input, shape index: {}]   ;;  %s1872_s7 = inlined_call_operand.vmem [shape: bf16[128,128], index: 7, kind: input, shape index: {}]   ;;  %s1873_s8 = inlined_call_operand.vmem [shape: f32[1,128], index: 8, kind: input, shape index: {}]   ;;  %s1874_s9 = inlined_call_operand.vmem [shape: f32[2,1,128], index: 9, kind: output, shape index: {0}]   ;;  %s1875_s10 = inlined_call_operand.hbm [shape: f32[2,1,128], index: 10, kind: output, shape index: {1}]  }
   0x1   :  { %18 = vsyncpa [#allocation3 + $0x1], 0  ;;  %s1605_s13 = smov 0   ;;  %s1607_s14 = smov 0  }
   0x2   :  { %s1609_s15 = smov 0   ;;  %s1611_s16 = smov 0  }
   0x3 LB: > { %s1626_s17 = sadd.s32 4294967295, %s1545_s16   ;;  %s1193_s18 = sadd.s32 4294967294, %s1545_s16   ;;  %s1545_s16 = sphi %s1611_s16, %s1881_s16   ;;  %s1541_s15 = sphi %s1609_s15, %s1880_s15   ;;  %s1537_s14 = sphi %s1607_s14, %s1879_s14   ;;  %s1533_s13 = sphi %s1605_s13, %s1878_s13  }
   0x4   : > { %s1630_s19 = sadd.s32 1, %s1545_s16   ;;  %s251_s20 = sadd.s32 1, %s1541_s15 }
   0x5   : > { %s248_s21 = ssub.s32 %s1545_s16, %s1630_s19  ;;  %p261_p0 = scmp.ne.s32.totalorder %s1541_s15, %s1537_s14 }
   0x6   : > { %p249_p1 = scmp.eq.s32.totalorder %s248_s21, 0  ;;  %p262_p2 = scmp.eq.s32.totalorder %s1626_s17, 1 }
   0x7   : > { %p267_p3 = scmp.ne.s32.totalorder %s1537_s14, %s1533_s13  ;;  %p268_p4 = scmp.eq.s32.totalorder %s1193_s18, 1 }
   0x8   : > { %s1641_s22 = scalar_select %p249_p1, %s1541_s15, %s251_s20  }
   0x9   : > { %p1643_p5 = por %p262_p2, %p261_p0  ;;  %p1647_p6 = por %p268_p4, %p267_p3 }
   0xa   : > { %p1196_p7 = scmp.ge.s32.totalorder %s1545_s16, 1  ;;  %p318_p8 = scmp.lt.s32.totalorder %s1545_s16, 3 }
   0xc   : > { %p319_p9 = pnand %p1196_p7, %p318_p8 }
   0xd   : > { %p358_p10 = scmp.lt.s32.totalorder (!%p319_p9), %s1626_s17, 1 }
   0xe   : > { %322 = sbr.rel (%p319_p9) target bundleno = 915 (0x393), region = 56 }
  0x13   : > { %v1443_v0 = vld [vmem:[%s1866_s1 + $0x8] sm:$0xff]   ;;  %v1444_v1 = vld [vmem:[%s1866_s1] sm:$0xff]   ;;  %s1661_s29 = scalar_select %p358_p10, %s1626_s17, 1  ;;  %vm495_vm0 = vcmask 261120   ;;  %v1461_v18 = vld [vmem:[%s1867_s2 + $0x38] sm:$0xff]   ;;  %v1547_v19 = vmov 0.0  }
  0x14   : > { %1306 = vmatprep.subr.bf16.mxu0 %v1443_v0  ;;  %1342 = vmatprep.subr.bf16.mxu1 %v1547_v19  ;;  %v1462_v20 = vld [vmem:[%s1867_s2 + $0x30] sm:$0xff]   ;;  %v1463_v21 = vld [vmem:[%s1867_s2 + $0x28] sm:$0xff]   ;;  %v1464_v22 = vld [vmem:[%s1867_s2 + $0x20] sm:$0xff]   ;;  %vm1548_vm1 = vmmov 0  }
  0x15   : > { %1307 = vmatpush3.bf16.msra.mxu0 %v1443_v0  ;;  %s1260_s30 = sshll.u32 %s1661_s29, 7  ;;  %1343 = vmatpush3.bf16.msra.mxu1 %v1461_v18  ;;  %v1465_v23 = vld [vmem:[%s1867_s2 + $0x18] sm:$0xff]   ;;  %v1466_v24 = vld [vmem:[%s1867_s2 + $0x10] sm:$0xff]   ;;  %v1467_v25 = vld [vmem:[%s1867_s2 + $0x8] sm:$0xff]   ;;  %s365_s27 = scalar_lea.vmem %s1874_s9, %s1661_s29 }
  0x16   : > { %1308 = vmatprep.subr.bf16.mxu0 %v1444_v1  ;;  %s1667_s18 = scalar_lea.vmem %s1865_s0, %s1260_s30  ;;  %1344 = vmatprep.subr.bf16.mxu1 %v1547_v19  ;;  %v1468_v26 = vld [vmem:[%s1867_s2] sm:$0xff]   ;;  %s356_s29 = sand.u32 1, %s1537_s14  }
  0x17   : > { %v1445_v2 = vld [vmem:[%s1667_s18] sm:$0xff]   ;;  %v1446_v3 = vld [vmem:[%s1667_s18 + $0x8] sm:$0xff]   ;;  %v1447_v4 = vld [vmem:[%s1667_s18 + $0x10] sm:$0xff]   ;;  %1358 = vmatprep.mubr.msk.bf16.mxu1 %vm1548_vm1, %v1547_v19  ;;  %s357_s20 = scalar_lea.vmem [#allocation2], %s356_s29  ;;  %s1104_s28 = scalar_lea.sflag [#allocation3], %s356_s29 }
  0x18   : > { %1310 = vmatprep.mubr.msk.bf16.mxu0 %vm495_vm0, %v1445_v2  ;;  %v1448_v5 = vld [vmem:[%s1667_s18 + $0x18] sm:$0xff]   ;;  %v1449_v6 = vld [vmem:[%s1667_s18 + $0x20] sm:$0xff]   ;;  %v1450_v7 = vld [vmem:[%s1667_s18 + $0x28] sm:$0xff]   ;;  %s1119_s21 = sshll.u32 %s357_s20, 4  ;;  %s1826_s21 = int_to_ptr.vmem [resolvable:$true] %s1119_s21 }
  0x19   : > { %1309 = vmatpush3.bf16.msra.mxu0 %v1444_v1  ;;  %v1451_v8 = vld [vmem:[%s1667_s18 + $0x30] sm:$0xff]   ;;  %v1452_v9 = vld [vmem:[%s1667_s18 + $0x38] sm:$0xff]   ;;  %v1453_v10 = vld [vmem:[%s1667_s18 + $0x40] sm:$0xff]   ;;  %1345 = vmatpush3.bf16.msra.mxu1 %v1462_v20  ;;  %s1485_s30 = scalar_lea.vmem %s1826_s21, 16 }
  0x1a   : > { %v1454_v11 = vld [vmem:[%s1667_s18 + $0x48] sm:$0xff]   ;;  %v1455_v12 = vld [vmem:[%s1667_s18 + $0x50] sm:$0xff]   ;;  %v1456_v13 = vld [vmem:[%s1667_s18 + $0x58] sm:$0xff]   ;;  %1382 = vmatprep.subr.bf16.mxu0 %v1547_v19  ;;  %1346 = vmatprep.subr.bf16.mxu1 %v1547_v19  ;;  %p1486_p11 = scmp.ne.s32.totalorder %s1826_s21, %s1485_s30 }
  0x1b   : > { %v1457_v14 = vld [vmem:[%s1667_s18 + $0x60] sm:$0xff]   ;;  %v1458_v15 = vld [vmem:[%s1667_s18 + $0x68] sm:$0xff]   ;;  %v1459_v16 = vld [vmem:[%s1667_s18 + $0x70] sm:$0xff]  }
  0x1c   : > { %1311 = vmatmul.mubr.msk.bf16.vlgmr.msra.gmra.mxu0 %vm495_vm0, %v1446_v3  ;;  %v1460_v17 = vld [vmem:[%s1667_s18 + $0x78] sm:$0xff]   ;;  %s1257_s18 = sshll.u32 %s1626_s17, 4  ;;  %p1487_p12 = pnand %p1486_p11, %p1643_p5 }
  0x1d   : > { %1314 = vmatprep.mubr.msk.bf16.mxu0 %vm495_vm0, %v1447_v4  ;;  %1347 = vmatpush3.bf16.msra.mxu1 %v1463_v21  ;;  %s1549_s17 = smov [#allocation2]  }
  0x1e   : > { %1348 = vmatprep.subr.bf16.mxu1 %v1547_v19  ;;  %p1488_p13 = pneg %p1487_p12  ;;  %s1489_s11 = sshll.u32 %s1549_s17, 4  ;;  %s1490_s11 = int_to_ptr.vmem [resolvable:$false] %s1489_s11 }
  0x1f   : > { %s1491_s12 = scalar_lea.vmem %s1490_s11, 32  ;;  %p1492_p0 = scmp.lt.s32.totalorder %s1826_s21, %s1490_s11 }
  0x20   : > { %p1493_p1 = scmp.lt.s32.totalorder %s1491_s12, %s1485_s30 }
  0x21   : > { %1349 = vmatpush3.bf16.msra.mxu1 %v1464_v22 }
  0x22   : > { %1350 = vmatprep.subr.bf16.mxu1 %v1547_v19  ;;  %p1494_p2 = por %p1493_p1, %p1492_p0 }
  0x24   : > { %1315 = vmatmul.mubr.msk.bf16.gmra.mxu0 %vm495_vm0, %v1448_v5  ;;  %p1495_p3 = pnand %p1494_p2, %p1488_p13 }
  0x25   : > { %1318 = vmatprep.mubr.msk.bf16.mxu0 %vm495_vm0, %v1449_v6  ;;  %1351 = vmatpush3.bf16.msra.mxu1 %v1465_v23 }
  0x26   : > { %1352 = vmatprep.subr.bf16.mxu1 %v1547_v19 }
  0x29   : > { %1353 = vmatpush3.bf16.msra.mxu1 %v1466_v24 }
  0x2a   : > { %1354 = vmatprep.subr.bf16.mxu1 %v1547_v19 }
  0x2c   : > { %1319 = vmatmul.mubr.msk.bf16.gmra.mxu0 %vm495_vm0, %v1450_v7 }
  0x2d   : > { %1322 = vmatprep.mubr.msk.bf16.mxu0 %vm495_vm0, %v1451_v8  ;;  %1355 = vmatpush3.bf16.msra.mxu1 %v1467_v25 }
  0x2e   : > { %1356 = vmatprep.subr.bf16.mxu1 %v1547_v19 }
  0x31   : > { %1357 = vmatpush3.bf16.msra.mxu1 %v1468_v26 }
  0x32   : > { %1362 = vmatprep.subr.bf16.mxu1 %v1547_v19 }
  0x34   : > { %1323 = vmatmul.mubr.msk.bf16.gmra.mxu0 %vm495_vm0, %v1452_v9 }
  0x35   : > { %1326 = vmatprep.mubr.msk.bf16.mxu0 %vm495_vm0, %v1453_v10 }
  0x3c   : > { %1327 = vmatmul.mubr.msk.bf16.gmra.mxu0 %vm495_vm0, %v1454_v11 }
  0x3d   : > { %1330 = vmatprep.mubr.msk.bf16.mxu0 %vm495_vm0, %v1455_v12 }
  0x44   : > { %1331 = vmatmul.mubr.msk.bf16.gmra.mxu0 %vm495_vm0, %v1456_v13 }
  0x45   : > { %1334 = vmatprep.mubr.msk.bf16.mxu0 %vm495_vm0, %v1457_v14 }
  0x4c   : > { %1335 = vmatmul.mubr.msk.bf16.gmra.mxu0 %vm495_vm0, %v1458_v15 }
  0x4d   : > { %1338 = vmatprep.mubr.msk.bf16.mxu0 %vm495_vm0, %v1459_v16 }
  0x54   : > { %1339 = vmatmul.mubr.msk.bf16.gmra.mxu0 %vm495_vm0, %v1460_v17 }
  0x55   : > { %1398 = vmatprep.mubr.msk.bf16.mxu0 %vm1548_vm1, %v1547_v19 }
  0xdc   : > { %v1312_v27 = vpop.f32.mrf.mxu0 }
  0xdd   : > { %v707_v34 = vmax.f32 %v1312_v27, 0.0 }
  0xde   : > { %v578_v28 = vpop.f32.mrf.mxu0 }
  0xdf   : > { %v705_v31 = vmax.f32 %v578_v28, 0.0 }
  0xe0   : > { %v1313_v29 = vpop.f32.mrf.mxu0 }
  0xe1   : > { %v708_v37 = vmax.f32 %v1313_v29, 0.0 }
  0xe2   : > { %v581_v30 = vpop.f32.mrf.mxu0 }
  0xe3   : > { %v706_v32 = vmax.f32 %v581_v30, 0.0 }
  0xe4   : > { %v1316_v33 = vpop.f32.mrf.mxu0 }
  0xe5   : > { %v737_v35 = vadd.f32 %v706_v32, %v705_v31  ;;  %v711_v46 = vmax.f32 %v1316_v33, 0.0 }
  0xe6   : > { %v594_v36 = vpop.f32.mrf.mxu0 }
  0xe7   : > { %v738_v38 = vadd.f32 %v737_v35, %v707_v34  ;;  %v709_v40 = vmax.f32 %v594_v36, 0.0 }
  0xe8   : > { %v1317_v39 = vpop.f32.mrf.mxu0 }
  0xe9   : > { %v739_v41 = vadd.f32 %v738_v38, %v708_v37  ;;  %v712_v49 = vmax.f32 %v1317_v39, 0.0 }
  0xea   : > { %v597_v42 = vpop.f32.mrf.mxu0 }
  0xeb   : > { %v740_v43 = vadd.f32 %v739_v41, %v709_v40  ;;  %v710_v44 = vmax.f32 %v597_v42, 0.0 }
  0xec   : > { %v1320_v45 = vpop.f32.mrf.mxu0 }
  0xed   : > { %v741_v47 = vadd.f32 %v740_v43, %v710_v44  ;;  %v715_v58 = vmax.f32 %v1320_v45, 0.0 }
  0xee   : > { %v610_v48 = vpop.f32.mrf.mxu0 }
  0xef   : > { %v742_v50 = vadd.f32 %v741_v47, %v711_v46  ;;  %v713_v52 = vmax.f32 %v610_v48, 0.0 }
  0xf0   : > { %v1321_v51 = vpop.f32.mrf.mxu0 }
  0xf1   : > { %v743_v53 = vadd.f32 %v742_v50, %v712_v49  ;;  %v716_v61 = vmax.f32 %v1321_v51, 0.0 }
  0xf2   : > { %v613_v54 = vpop.f32.mrf.mxu0 }
  0xf3   : > { %v744_v55 = vadd.f32 %v743_v53, %v713_v52  ;;  %v714_v56 = vmax.f32 %v613_v54, 0.0 }
  0xf4   : > { %v1324_v57 = vpop.f32.mrf.mxu0 }
  0xf5   : > { %v745_v59 = vadd.f32 %v744_v55, %v714_v56  ;;  %v719_v6 = vmax.f32 %v1324_v57, 0.0 }
  0xf6   : > { %v626_v60 = vpop.f32.mrf.mxu0 }
  0xf7   : > { %v746_v62 = vadd.f32 %v745_v59, %v715_v58  ;;  %v717_v0 = vmax.f32 %v626_v60, 0.0 }
  0xf8   : > { %v1325_v63 = vpop.f32.mrf.mxu0 }
  0xf9   : > { %v747_v1 = vadd.f32 %v746_v62, %v716_v61  ;;  %v720_v9 = vmax.f32 %v1325_v63, 0.0 }
  0xfa   : > { %v629_v2 = vpop.f32.mrf.mxu0 }
  0xfb   : > { %v748_v3 = vadd.f32 %v747_v1, %v717_v0  ;;  %v718_v4 = vmax.f32 %v629_v2, 0.0  ;;  %v1469_v2 = vld [vmem:[%s1870_s5 + $0x38] sm:$0xff]  }
  0xfc   : > { %v1328_v5 = vpop.f32.mrf.mxu0 }
  0xfd   : > { %v749_v7 = vadd.f32 %v748_v3, %v718_v4  ;;  %v723_v18 = vmax.f32 %v1328_v5, 0.0  ;;  %v1470_v4 = vld [vmem:[%s1870_s5 + $0x30] sm:$0xff]   ;;  %v1471_v5 = vld [vmem:[%s1870_s5 + $0x28] sm:$0xff]  }
  0xfe   : > { %v642_v8 = vpop.f32.mrf.mxu0 }
  0xff   : > { %v750_v10 = vadd.f32 %v749_v7, %v719_v6  ;;  %v721_v12 = vmax.f32 %v642_v8, 0.0  ;;  %v1472_v6 = vld [vmem:[%s1870_s5 + $0x20] sm:$0xff]   ;;  %v1473_v7 = vld [vmem:[%s1870_s5 + $0x18] sm:$0xff]   ;;  %v1474_v8 = vld [vmem:[%s1870_s5 + $0x10] sm:$0xff]  }
 0x100   : > { %v1329_v11 = vpop.f32.mrf.mxu0 }
 0x101   : > { %v751_v13 = vadd.f32 %v750_v10, %v720_v9  ;;  %v724_v22 = vmax.f32 %v1329_v11, 0.0  ;;  %v1475_v9 = vld [vmem:[%s1870_s5 + $0x8] sm:$0xff]   ;;  %v1476_v10 = vld [vmem:[%s1870_s5] sm:$0xff]   ;;  %v1477_v11 = vld [vmem:[%s1872_s7 + $0x38] sm:$0xff]  }
 0x102   : > { %v645_v14 = vpop.f32.mrf.mxu0  ;;  %1383 = vmatpush3.bf16.msra.mxu0 %v1477_v11 }
 0x103   : > { %v752_v15 = vadd.f32 %v751_v13, %v721_v12  ;;  %v722_v16 = vmax.f32 %v645_v14, 0.0  ;;  %v1478_v12 = vld [vmem:[%s1872_s7 + $0x30] sm:$0xff]   ;;  %1384 = vmatprep.subr.bf16.mxu0 %v1547_v19  ;;  %v1479_v13 = vld [vmem:[%s1872_s7 + $0x28] sm:$0xff]   ;;  %v1480_v14 = vld [vmem:[%s1872_s7 + $0x20] sm:$0xff]  }
 0x104   : > { %v1332_v17 = vpop.f32.mrf.mxu0 }
 0x105   : > { %v753_v20 = vadd.f32 %v752_v15, %v722_v16  ;;  %v727_v31 = vmax.f32 %v1332_v17, 0.0  ;;  %v1481_v15 = vld [vmem:[%s1872_s7 + $0x18] sm:$0xff]   ;;  %v1482_v16 = vld [vmem:[%s1872_s7 + $0x10] sm:$0xff]   ;;  %v1483_v17 = vld [vmem:[%s1872_s7 + $0x8] sm:$0xff]  }
 0x106   : > { %v658_v21 = vpop.f32.mrf.mxu0  ;;  %1385 = vmatpush3.bf16.msra.mxu0 %v1478_v12 }
 0x107   : > { %v754_v23 = vadd.f32 %v753_v20, %v723_v18  ;;  %v725_v25 = vmax.f32 %v658_v21, 0.0  ;;  %1386 = vmatprep.subr.bf16.mxu0 %v1547_v19  ;;  %v1484_v18 = vld [vmem:[%s1872_s7] sm:$0xff]  }
 0x108   : > { %v1333_v24 = vpop.f32.mrf.mxu0  ;;  %v792_v20 = vld [vmem:[%s1868_s3] sm:$0x1] }
 0x109   : > { %v755_v26 = vadd.f32 %v754_v23, %v724_v22  ;;  %v728_v34 = vmax.f32 %v1333_v24, 0.0  ;;  %v881_v21 = vld [vmem:[%s1869_s4] sm:$0x1] }
 0x10a   : > { %v661_v27 = vpop.f32.mrf.mxu0  ;;  %1387 = vmatpush3.bf16.msra.mxu0 %v1479_v13  ;;  %vm882_vm2 = vcmp.gt.f32.partialorder %v881_v21, 0.0 }
 0x10b   : > { %v756_v28 = vadd.f32 %v755_v26, %v725_v25  ;;  %v726_v29 = vmax.f32 %v661_v27, 0.0  ;;  %1388 = vmatprep.subr.bf16.mxu0 %v1547_v19 }
 0x10c   : > { %v1336_v30 = vpop.f32.mrf.mxu0 }
 0x10d   : > { %v757_v32 = vadd.f32 %v756_v28, %v726_v29  ;;  %v731_v43 = vmax.f32 %v1336_v30, 0.0  ;;  %v903_v29 = vld [vmem:[%s1871_s6] sm:$0x1] }
 0x10e   : > { %v674_v33 = vpop.f32.mrf.mxu0  ;;  %1389 = vmatpush3.bf16.msra.mxu0 %v1480_v14 }
 0x10f   : > { %v758_v35 = vadd.f32 %v757_v32, %v727_v31  ;;  %v729_v37 = vmax.f32 %v674_v33, 0.0  ;;  %1390 = vmatprep.subr.bf16.mxu0 %v1547_v19 }
 0x110   : > { %v1337_v36 = vpop.f32.mrf.mxu0 }
 0x111   : > { %v759_v38 = vadd.f32 %v758_v35, %v728_v34  ;;  %v732_v46 = vmax.f32 %v1337_v36, 0.0 }
 0x112   : > { %v677_v39 = vpop.f32.mrf.mxu0  ;;  %1391 = vmatpush3.bf16.msra.mxu0 %v1481_v15 }
 0x113   : > { %v760_v40 = vadd.f32 %v759_v38, %v729_v37  ;;  %v730_v41 = vmax.f32 %v677_v39, 0.0  ;;  %1392 = vmatprep.subr.bf16.mxu0 %v1547_v19  ;;  %v1010_v37 = vld [vmem:[%s1873_s8] sm:$0x1] }
 0x114   : > { %v1340_v42 = vpop.f32.mrf.mxu0 }
 0x115   : > { %v761_v44 = vadd.f32 %v760_v40, %v730_v41  ;;  %v735_v54 = vmax.f32 %v1340_v42, 0.0 }
 0x116   : > { %v690_v45 = vpop.f32.mrf.mxu0  ;;  %1393 = vmatpush3.bf16.msra.mxu0 %v1482_v16 }
 0x117   : > { %v762_v47 = vadd.f32 %v761_v44, %v731_v43  ;;  %v733_v49 = vmax.f32 %v690_v45, 0.0  ;;  %1394 = vmatprep.subr.bf16.mxu0 %v1547_v19 }
 0x118   : > { %v1341_v48 = vpop.f32.mrf.mxu0 }
 0x119   : > { %v763_v50 = vadd.f32 %v762_v47, %v732_v46  ;;  %v736_v56 = vmax.f32 %v1341_v48, 0.0 }
 0x11a   : > { %v693_v51 = vpop.f32.mrf.mxu0  ;;  %1395 = vmatpush3.bf16.msra.mxu0 %v1483_v17 }
 0x11b   : > { %v764_v52 = vadd.f32 %v763_v50, %v733_v49  ;;  %v734_v53 = vmax.f32 %v693_v51, 0.0  ;;  %1396 = vmatprep.subr.bf16.mxu0 %v1547_v19 }
 0x11d   : > { %v765_v55 = vadd.f32 %v764_v52, %v734_v53 }
 0x11e   : > { %1397 = vmatpush3.bf16.msra.mxu0 %v1484_v18 }
 0x11f   : > { %v766_v57 = vadd.f32 %v765_v55, %v735_v54 }
 0x121   : > { %v767_v58 = vadd.f32 %v766_v57, %v736_v56 }
 0x123   : > { %v768_v59 = vrot.slane %v767_v58, 4 }
 0x125   : > { %v769_v60 = vadd.f32 %v768_v59, %v767_v58 }
 0x127   : > { %v770_v61 = vrot.slane %v769_v60, 2 }
 0x129   : > { %v771_v62 = vadd.f32 %v770_v61, %v769_v60 }
 0x12b   : > { %v772_v63 = vrot.slane %v771_v62, 1 }
 0x12d   : > { %v773_v0 = vadd.f32 %v772_v63, %v771_v62 }
 0x12f   : > { %v774_v1 = vmul.f32 0.00390625, %v773_v0 }
 0x131   : > { %v775_v3 = vpack.c.bf16 %v774_v1, %v774_v1 }
 0x133   : > { %1359 = vmatmul.mubr.bf16.vlgmr.msra.gmra.mxu1 %v775_v3 }
 0x134   : > { %1363 = vmatpush3.bf16.msra.mxu1 %v1469_v2  ;;  %1378 = vmatprep.mubr.msk.bf16.mxu1 %vm1548_vm1, %v1547_v19 }
 0x135   : > { %1364 = vmatprep.subr.bf16.mxu1 %v1547_v19 }
 0x138   : > { %1365 = vmatpush3.bf16.msra.mxu1 %v1470_v4 }
 0x139   : > { %1366 = vmatprep.subr.bf16.mxu1 %v1547_v19 }
 0x13c   : > { %1367 = vmatpush3.bf16.msra.mxu1 %v1471_v5 }
 0x13d   : > { %1368 = vmatprep.subr.bf16.mxu1 %v1547_v19 }
 0x140   : > { %1369 = vmatpush3.bf16.msra.mxu1 %v1472_v6 }
 0x141   : > { %1370 = vmatprep.subr.bf16.mxu1 %v1547_v19 }
 0x144   : > { %1371 = vmatpush3.bf16.msra.mxu1 %v1473_v7 }
 0x145   : > { %1372 = vmatprep.subr.bf16.mxu1 %v1547_v19 }
 0x148   : > { %1373 = vmatpush3.bf16.msra.mxu1 %v1474_v8 }
 0x149   : > { %1374 = vmatprep.subr.bf16.mxu1 %v1547_v19 }
 0x14c   : > { %1375 = vmatpush3.bf16.msra.mxu1 %v1475_v9 }
 0x14d   : > { %1376 = vmatprep.subr.bf16.mxu1 %v1547_v19 }
 0x150   : > { %1377 = vmatpush3.bf16.msra.mxu1 %v1476_v10 }
 0x1f3   : > { %v875_v22 = vpop.f32.mrf.mxu1 }
 0x1f4   : > { %v876_v23 = vadd.f32 %v875_v22, %v792_v20 }
 0x1f5   : > { %v1360_v24 = vpop.f32.mrf.mxu1 }
 0x1f6   : > { %v883_v25 = vmax.f32 %v876_v23, 0.0 }
 0x1f7   : > { %v878_v19 = vpop.f32.mrf.mxu1 }
 0x1f8   : > { %v884_v26 = vsel %vm882_vm2, %v883_v25, %v876_v23 }
 0x1f9   : > { %885 = vst [vmem:[%s365_s27] sm:$0x1] %v884_v26  ;;  %v886_v27 = vpack.c.bf16 %v884_v26, %v884_v26  ;;  %v1361_v28 = vpop.f32.mrf.mxu1  ;;  %s1824_s27 = scalar_lea.hbm %s1875_s10, %s1257_s18 }
 0x1fb   : > { %1379 = vmatmul.mubr.bf16.vlgmr.msra.gmra.mxu1 %v886_v27 }
 0x2bb   : > { %v986_v30 = vpop.f32.mrf.mxu1 }
 0x2bc   : > { %v987_v31 = vadd.f32 %v986_v30, %v903_v29 }
 0x2bd   : > { %v1380_v32 = vpop.f32.mrf.mxu1 }
 0x2be   : > { %v992_v33 = vmax.f32 %v987_v31, 0.0 }
 0x2bf   : > { %v989_v34 = vpop.f32.mrf.mxu1 }
 0x2c0   : > { %v993_v35 = vpack.c.bf16 %v992_v33, %v992_v33 }
 0x2c1   : > { %v1381_v36 = vpop.f32.mrf.mxu1 }
 0x2c2   : > { %1399 = vmatmul.mubr.bf16.vlgmr.msra.gmra.mxu0 %v993_v35 }
 0x382   : > { %v1093_v38 = vpop.f32.mrf.mxu0 }
 0x383   : > { %v1094_v39 = vadd.f32 %v1093_v38, %v1010_v37 }
 0x384   : > { %v1400_v40 = vpop.f32.mrf.mxu0 }
 0x385   : > { %1099 = vst [vmem:[%s357_s20] sm:$0x1] %v1094_v39 }
 0x386   : > { %v1096_v41 = vpop.f32.mrf.mxu0 }
 0x387   : > { %1498 = shalt.err (!%p1495_p3)
}
 0x388   : > { %s1499_s18 = scalar_lea.hbm %s1824_s27, 16  ;;  %s1503_s25 = scalar_lea.hbm %s1875_s10, 32 }
 0x389   : > { %p1500_p4 = scmp.ne.s32.totalorder %s1824_s27, %s1499_s18  ;;  %p1504_p9 = scmp.lt.s32.totalorder %s1824_s27, %s1875_s10 }
 0x38a   : > { %p1505_p10 = scmp.lt.s32.totalorder %s1503_s25, %s1499_s18 }
 0x38b   : > { %p1501_p7 = pnand %p1500_p4, %p1643_p5 }
 0x38c   : > { %p1506_p11 = por %p1505_p10, %p1504_p9 }
 0x38d   : > { %p1502_p8 = pneg %p1501_p7 }
 0x38f   : > { %p1507_p12 = pnand %p1506_p11, %p1502_p8 }
 0x391   : > { %1510 = shalt.err (!%p1507_p12)
}
 0x392   : > { %1402 = dma.vmem_to_hbm [thread:$0]  (%p1643_p5), %s1826_s21, 16, %s1824_s27, %s1104_s28   ;;  %v1401_v42 = vpop.f32.mrf.mxu0 }
 0x393 PF: > { %p1408_p13 = scmp.ge.s32.totalorder %s1545_s16, 2  ;;  %s1137_s30 = sand.u32 1, %s1533_s13  }
 0x394   : > { %s1138_s11 = scalar_lea.sflag [#allocation3], %s1137_s30 }
 0x395   : > { %p1405_p0 = pnand %p1408_p13, %p1647_p6 }
 0x397   : > { %p1406_p1 = pneg %p1405_p0 }
 0x399   : > { %1528 = dma.done.wait (%p1406_p1), %s1138_s11, 16  }
 0x39a   : > { %1530 = vsyncadd (%p1406_p1), %s1138_s11, 4294967280  ;;  %p21_p2 = scmp.ge.s32.totalorder %s1630_s19, 4   ;;  %s1878_s13 = smov %s1537_s14 }
 0x39b   : > { %s1879_s14 = smov %s1541_s15  ;;  %s1880_s15 = smov %s1641_s22 }
 0x39c   : > { %s1881_s16 = smov %s1630_s19  ;;  %23 = sbr.rel (!%p21_p2) target bundleno = 3 (0x3), region = 103 }
 0x3a1   :  { %1142 = vsyncpa [#allocation3], 1 }
 0x3a2   :  { %1144 = vsyncpa [#allocation3 + $0x1], 1 }

</bundles_post_ra>
